<compile_context>
chip_gen: v5e
topology: v5e:2x2
jax: 0.10.0
libtpu: 0.0.40
codegen_flags: <defaults>
</compile_context>

<pallas_src>
import math
import functools
import numpy as np
import jax
import jax.numpy as jnp
from jax.experimental import pallas as pl
from jax.experimental.pallas import tpu as pltpu


# ----------------------------------------------------------------------------
# Shared math helpers (used both inside kernels and in the pure-JAX reference)
# ----------------------------------------------------------------------------
def _bdot(a, b):
    """MXU matmul: bf16 operands, f32 accumulation."""
    return jnp.dot(a.astype(jnp.bfloat16), b.astype(jnp.bfloat16),
                   preferred_element_type=jnp.float32)


def _bdot_tn(a, b):
    """(V, d) x (V, D) -> (d, D), contracting over the leading (node) axis."""
    dn = (((0,), (0,)), ((), ()))
    return jax.lax.dot_general(a.astype(jnp.bfloat16), b.astype(jnp.bfloat16), dn,
                               preferred_element_type=jnp.float32)


def _layernorm(t, g, b):
    mu = jnp.mean(t, axis=-1, keepdims=True)
    var = jnp.mean((t - mu) ** 2, axis=-1, keepdims=True)
    return (t - mu) * jax.lax.rsqrt(var + 1e-5) * g + b


def _row_tile(n):
    for t in (512, 256, 128):
        if n % t == 0:
            return t
    return n


# ----------------------------------------------------------------------------
# Pallas kernels
# ----------------------------------------------------------------------------
def _linear_kernel(x_ref, w_ref, b_ref, o_ref):
    o_ref[...] = _bdot(x_ref[...], w_ref[...]) + b_ref[...]


def linear_pallas(x2d, w, b):
    N, Din = x2d.shape
    Dout = w.shape[1]
    tm = _row_tile(N)
    return pl.pallas_call(
        _linear_kernel,
        grid=(N // tm,),
        in_specs=[pl.BlockSpec((tm, Din), lambda i: (i, 0)),
                  pl.BlockSpec((Din, Dout), lambda i: (0, 0)),
                  pl.BlockSpec((1, Dout), lambda i: (0, 0))],
        out_specs=pl.BlockSpec((tm, Dout), lambda i: (i, 0)),
        out_shape=jax.ShapeDtypeStruct((N, Dout), jnp.float32),
        compiler_params=pltpu.CompilerParams(dimension_semantics=("parallel",)),
    )(x2d, w, b.reshape(1, Dout))


def _mlp2_kernel(x_ref, w1_ref, b1_ref, w2_ref, b2_ref, o_ref):
    # TODO(synk): dropout between fc1/fc2 omitted (eval mode, drop=0.0).
    h = jnp.maximum(_bdot(x_ref[...], w1_ref[...]) + b1_ref[...], 0.0)
    o_ref[...] = _bdot(h, w2_ref[...]) + b2_ref[...]


def mlp2_pallas(x2d, w1, b1, w2, b2):
    N, Din = x2d.shape
    Dh, Dout = w1.shape[1], w2.shape[1]
    tm = _row_tile(N)
    return pl.pallas_call(
        _mlp2_kernel,
        grid=(N // tm,),
        in_specs=[pl.BlockSpec((tm, Din), lambda i: (i, 0)),
                  pl.BlockSpec((Din, Dh), lambda i: (0, 0)),
                  pl.BlockSpec((1, Dh), lambda i: (0, 0)),
                  pl.BlockSpec((Dh, Dout), lambda i: (0, 0)),
                  pl.BlockSpec((1, Dout), lambda i: (0, 0))],
        out_specs=pl.BlockSpec((tm, Dout), lambda i: (i, 0)),
        out_shape=jax.ShapeDtypeStruct((N, Dout), jnp.float32),
        compiler_params=pltpu.CompilerParams(dimension_semantics=("parallel",)),
    )(x2d, w1, b1.reshape(1, Dh), w2, b2.reshape(1, Dout))


def _gnn_stack_kernel(x_ref, z_ref, a_ref, mix_ref, w1_ref, b1_ref, w2_ref,
                      b2_ref, g_ref, be_ref, o_ref, xcur_ref, *, num_relation):
    l = pl.program_id(1)

    @pl.when(l == 0)
    def _():
        xcur_ref[...] = x_ref[...]          # load the layer-0 input once per batch

    x = xcur_ref[...]                       # (V, D) carried across the layer axis
    z = z_ref[...]                          # (R, D)
    V = x.shape[0]

    # one big MXU matmul for all relations: (R*V, V) @ (V, D) -> (R*V, D)
    msg = jnp.dot(a_ref[...], x.astype(jnp.bfloat16),
                  preferred_element_type=jnp.float32)
    acc = jnp.zeros_like(x)
    for r in range(num_relation):           # tiny static VPU combine over relations
        acc = acc + z[r, :][None, :] * msg[r * V:(r + 1) * V, :]

    t = acc + mix_ref[...] * x              # alpha / beta mix
    h = jnp.maximum(_bdot(t, w1_ref[...]) + b1_ref[...], 0.0)
    h = _bdot(h, w2_ref[...]) + b2_ref[...]
    hn = _layernorm(h, g_ref[...], be_ref[...])
    xnew = hn + x                           # residual
    xcur_ref[...] = xnew
    o_ref[...] = xnew                       # flushed once per batch (same block idx)


def gnn_stack_pallas(x, z_stack, A2d, mix_s, w1_s, b1_s, w2_s, b2_s, g_s, be_s):
    B, V, D = x.shape
    L = w1_s.shape[0]
    RV = A2d.shape[0]
    R = RV // V
    kern = functools.partial(_gnn_stack_kernel, num_relation=R)
    return pl.pallas_call(
        kern,
        grid=(B, L),
        in_specs=[
            pl.BlockSpec((None, V, D), lambda b, l: (b, 0, 0)),          # x
            pl.BlockSpec((None, None, R, D), lambda b, l: (l, b, 0, 0)),  # z per layer
            pl.BlockSpec((RV, V), lambda b, l: (0, 0)),                  # A2d (resident)
            pl.BlockSpec((None, 1, D), lambda b, l: (l, 0, 0)),          # mix
            pl.BlockSpec((None, D, D), lambda b, l: (l, 0, 0)),          # w1
            pl.BlockSpec((None, 1, D), lambda b, l: (l, 0, 0)),          # b1
            pl.BlockSpec((None, D, D), lambda b, l: (l, 0, 0)),          # w2
            pl.BlockSpec((None, 1, D), lambda b, l: (l, 0, 0)),          # b2
            pl.BlockSpec((None, 1, D), lambda b, l: (l, 0, 0)),          # ln gamma
            pl.BlockSpec((None, 1, D), lambda b, l: (l, 0, 0)),          # ln beta
        ],
        out_specs=pl.BlockSpec((None, V, D), lambda b, l: (b, 0, 0)),
        out_shape=jax.ShapeDtypeStruct((B, V, D), jnp.float32),
        scratch_shapes=[pltpu.VMEM((V, D), jnp.float32)],
        compiler_params=pltpu.CompilerParams(
            dimension_semantics=("parallel", "arbitrary")),
    )(x, z_stack, A2d, mix_s, w1_s, b1_s.reshape(L, 1, D), w2_s,
      b2_s.reshape(L, 1, D), g_s.reshape(L, 1, D), be_s.reshape(L, 1, D))


def _qk_attn_kernel(qkx_ref, vx_ref, w_ref, b_ref, lam_ref, o_ref, *,
                    num_heads, head_dim, num_node):
    D = num_heads * head_dim
    d2 = 2 * head_dim
    qk = _bdot(qkx_ref[...], w_ref[...]) + b_ref[...]        # fc_to_qk: (V, 4D)
    q, k = qk[:, :2 * D], qk[:, 2 * D:]
    v = vx_ref[...]                                          # (V, D)
    lam = lam_ref[0, 0]                                      # scalar from SMEM
    houts = []
    for h in range(num_heads):                               # all heads, one grid step
        qh = q[:, h * d2:(h + 1) * d2]
        kh = k[:, h * d2:(h + 1) * d2]
        vh = v[:, h * head_dim:(h + 1) * head_dim]
        qn = qh * jax.lax.rsqrt(
            jnp.maximum(jnp.sum(qh * qh, axis=-1, keepdims=True), 1e-24))
        kn = kh * jax.lax.rsqrt(
            jnp.maximum(jnp.sum(kh * kh, axis=-1, keepdims=True), 1e-24))
        q1, q2 = qn[:, :head_dim], qn[:, head_dim:]
        k1, k2 = kn[:, :head_dim], kn[:, head_dim:]
        kvs1 = _bdot_tn(k1, vh)
        kvs2 = _bdot_tn(k2, vh)
        num = _bdot(q1, kvs1) - lam * _bdot(q2, kvs2)
        num = num + jnp.sum(vh, axis=0, keepdims=True) + vh * float(num_node)
        ksum = jnp.sum(kn, axis=0, keepdims=True)
        den = jnp.sum(qn * ksum, axis=-1, keepdims=True) + 2.0 * float(num_node)
        houts.append(num * pl.reciprocal(den, approx=True))
    o_ref[...] = jnp.concatenate(houts, axis=-1)             # lane-dense (V, D) store


def qk_attn_pallas(qk_x, v_x, w, b, lam, num_heads):
    B, V, D = v_x.shape
    hd = D // num_heads
    lam2d = jnp.reshape(lam, (1, 1)).astype(jnp.float32)
    kern = functools.partial(_qk_attn_kernel, num_heads=num_heads,
                             head_dim=hd, num_node=V)
    return pl.pallas_call(
        kern,
        grid=(B,),
        in_specs=[pl.BlockSpec((None, V, D), lambda b_: (b_, 0, 0)),
                  pl.BlockSpec((None, V, D), lambda b_: (b_, 0, 0)),
                  pl.BlockSpec((D, 4 * D), lambda b_: (0, 0)),
                  pl.BlockSpec((1, 4 * D), lambda b_: (0, 0)),
                  pl.BlockSpec(memory_space=pltpu.MemorySpace.SMEM)],
        out_specs=pl.BlockSpec((None, V, D), lambda b_: (b_, 0, 0)),
        out_shape=jax.ShapeDtypeStruct((B, V, D), jnp.float32),
        compiler_params=pltpu.CompilerParams(dimension_semantics=("parallel",)),
    )(qk_x, v_x, w, b.reshape(1, 4 * D), lam2d)


def _epilogue_kernel(x_ref, a_ref, g1_ref, be1_ref, w1_ref, b1_ref, w2_ref,
                     b2_ref, g2_ref, be2_ref, o_ref):
    x1 = _layernorm(x_ref[...] + a_ref[...], g1_ref[...], be1_ref[...])
    h = jnp.maximum(_bdot(x1, w1_ref[...]) + b1_ref[...], 0.0)
    f = _bdot(h, w2_ref[...]) + b2_ref[...]
    o_ref[...] = _layernorm(x1 + f, g2_ref[...], be2_ref[...])


def epilogue_pallas(x2d, a2d, g1, be1, w1, b1, w2, b2, g2, be2):
    N, D = x2d.shape
    Dh = w1.shape[1]
    tm = _row_tile(N)
    return pl.pallas_call(
        _epilogue_kernel,
        grid=(N // tm,),
        in_specs=[pl.BlockSpec((tm, D), lambda i: (i, 0)),
                  pl.BlockSpec((tm, D), lambda i: (i, 0)),
                  pl.BlockSpec((1, D), lambda i: (0, 0)),
                  pl.BlockSpec((1, D), lambda i: (0, 0)),
                  pl.BlockSpec((D, Dh), lambda i: (0, 0)),
                  pl.BlockSpec((1, Dh), lambda i: (0, 0)),
                  pl.BlockSpec((Dh, D), lambda i: (0, 0)),
                  pl.BlockSpec((1, D), lambda i: (0, 0)),
                  pl.BlockSpec((1, D), lambda i: (0, 0)),
                  pl.BlockSpec((1, D), lambda i: (0, 0))],
        out_specs=pl.BlockSpec((tm, D), lambda i: (i, 0)),
        out_shape=jax.ShapeDtypeStruct((N, D), jnp.float32),
        compiler_params=pltpu.CompilerParams(dimension_semantics=("parallel",)),
    )(x2d, a2d, g1.reshape(1, D), be1.reshape(1, D), w1, b1.reshape(1, Dh),
      w2, b2.reshape(1, D), g2.reshape(1, D), be2.reshape(1, D))


# ----------------------------------------------------------------------------
# Pure-JAX reference ops (identical math, used only for validation)
# ----------------------------------------------------------------------------
def linear_ref(x2d, w, b):
    return _bdot(x2d, w) + b[None, :]


def mlp2_ref(x2d, w1, b1, w2, b2):
    h = jnp.maximum(_bdot(x2d, w1) + b1[None, :], 0.0)
    return _bdot(h, w2) + b2[None, :]


def gnn_stack_ref(x, z_stack, A2d, mix_s, w1_s, b1_s, w2_s, b2_s, g_s, be_s):
    B, V, D = x.shape
    L = w1_s.shape[0]
    R = A2d.shape[0] // V
    outs = []
    for b in range(B):
        xb = x[b]
        for l in range(L):
            z = z_stack[l, b]
            msg = _bdot(A2d, xb)
            acc = jnp.zeros_like(xb)
            for r in range(R):
                acc = acc + z[r][None, :] * msg[r * V:(r + 1) * V]
            t = acc + mix_s[l] * xb
            h = jnp.maximum(_bdot(t, w1_s[l]) + b1_s[l][None, :], 0.0)
            h = _bdot(h, w2_s[l]) + b2_s[l][None, :]
            xb = _layernorm(h, g_s[l][None, :], be_s[l][None, :]) + xb
        outs.append(xb)
    return jnp.stack(outs, 0)


def qk_attn_ref(qk_x, v_x, w, b, lam, num_heads):
    B, V, D = v_x.shape
    hd = D // num_heads
    d2 = 2 * hd
    outs = []
    for bb in range(B):
        qk = _bdot(qk_x[bb], w) + b[None, :]
        q, k = qk[:, :2 * D], qk[:, 2 * D:]
        v = v_x[bb]
        houts = []
        for h in range(num_heads):
            qh = q[:, h * d2:(h + 1) * d2]
            kh = k[:, h * d2:(h + 1) * d2]
            vh = v[:, h * hd:(h + 1) * hd]
            qn = qh * jax.lax.rsqrt(
                jnp.maximum(jnp.sum(qh * qh, -1, keepdims=True), 1e-24))
            kn = kh * jax.lax.rsqrt(
                jnp.maximum(jnp.sum(kh * kh, -1, keepdims=True), 1e-24))
            q1, q2 = qn[:, :hd], qn[:, hd:]
            k1, k2 = kn[:, :hd], kn[:, hd:]
            kvs1 = _bdot_tn(k1, vh)
            kvs2 = _bdot_tn(k2, vh)
            num = _bdot(q1, kvs1) - lam * _bdot(q2, kvs2)
            num = num + jnp.sum(vh, axis=0, keepdims=True) + vh * float(V)
            ksum = jnp.sum(kn, axis=0, keepdims=True)
            den = jnp.sum(qn * ksum, axis=-1, keepdims=True) + 2.0 * float(V)
            houts.append(num / den)
        outs.append(jnp.concatenate(houts, axis=-1))
    return jnp.stack(outs, 0)


def epilogue_ref(x2d, a2d, g1, be1, w1, b1, w2, b2, g2, be2):
    x1 = _layernorm(x2d + a2d, g1[None, :], be1[None, :])
    h = jnp.maximum(_bdot(x1, w1) + b1[None, :], 0.0)
    f = _bdot(h, w2) + b2[None, :]
    return _layernorm(x1 + f, g2[None, :], be2[None, :])


PALLAS_OPS = dict(linear=linear_pallas, mlp2=mlp2_pallas, gnn_stack=gnn_stack_pallas,
                  qk_attn=qk_attn_pallas, epilogue=epilogue_pallas)
REF_OPS = dict(linear=linear_ref, mlp2=mlp2_ref, gnn_stack=gnn_stack_ref,
               qk_attn=qk_attn_ref, epilogue=epilogue_ref)


# ----------------------------------------------------------------------------
# KnowformerLayer forward (structure shared by the Pallas and reference paths)
# ----------------------------------------------------------------------------
def _stack_layer_params(layers):
    mix = jnp.stack([lp['mix'] for lp in layers], 0)   # (L, 1, D)
    w1 = jnp.stack([lp['w1'] for lp in layers], 0)
    b1 = jnp.stack([lp['b1'] for lp in layers], 0)
    w2 = jnp.stack([lp['w2'] for lp in layers], 0)
    b2 = jnp.stack([lp['b2'] for lp in layers], 0)
    g = jnp.stack([lp['ln_g'] for lp in layers], 0)
    be = jnp.stack([lp['ln_b'] for lp in layers], 0)
    return mix, w1, b1, w2, b2, g, be


def knowformer_forward(ops, params, num_heads, h_index, x, z, A2d, qk_noise):
    # r_index / rev_z / graph_mask are unused by the original forward (mask=None here).
    B, V, D = x.shape
    R = A2d.shape[0] // V

    # qk branch
    qk_z = ops['linear'](z, params['fc_qk_z_w'], params['fc_qk_z_b']).reshape(B, R, D)
    qk_in = jnp.concatenate([x, qk_noise], axis=-1).reshape(B * V, D + 1)
    qk_x = ops['mlp2'](qk_in, params['fc_qk_x_w1'], params['fc_qk_x_b1'],
                       params['fc_qk_x_w2'], params['fc_qk_x_b2']).reshape(B, V, D)
    if params['qk_layers']:
        L = len(params['qk_layers'])
        z_stack = jnp.broadcast_to(qk_z[None], (L, B, R, D))
        qk_x = ops['gnn_stack'](qk_x, z_stack, A2d,
                                *_stack_layer_params(params['qk_layers']))

    # v branch
    v_init = jnp.broadcast_to(
        jax.nn.one_hot(h_index, V, dtype=jnp.float32)[:, :, None], (B, V, D))
    v_in = jnp.concatenate([x, v_init], axis=-1).reshape(B * V, 2 * D)
    v_x = ops['mlp2'](v_in, params['fc_v_x_w1'], params['fc_v_x_b1'],
                      params['fc_v_x_w2'], params['fc_v_x_b2']).reshape(B, V, D)
    if params['v_layers']:
        vz = jnp.stack([ops['linear'](z, lp['fc_z_w'], lp['fc_z_b']).reshape(B, R, D)
                        for lp in params['v_layers']], axis=0)
        v_x = ops['gnn_stack'](v_x, vz, A2d,
                               *_stack_layer_params(params['v_layers']))

    # differential linear attention (fc_to_qk fused into the attention kernel)
    lam1 = jnp.exp(jnp.sum(params['lambda_q1'] * params['lambda_k1']))
    lam2 = jnp.exp(jnp.sum(params['lambda_q2'] * params['lambda_k2']))
    lam = lam1 - lam2 + params['lambda_init']
    attn = ops['qk_attn'](qk_x, v_x, params['fc_to_qk_w'], params['fc_to_qk_b'],
                          lam, num_heads)

    # fused residual + attn LayerNorm + FFN + final LayerNorm
    out = ops['epilogue'](x.reshape(B * V, D), attn.reshape(B * V, D),
                          params['attn_norm_g'], params['attn_norm_b'],
                          params['ffn_w1'], params['ffn_b1'],
                          params['ffn_w2'], params['ffn_b2'],
                          params['norm_g'], params['norm_b'])
    return out.reshape(B, V, D)


# ----------------------------------------------------------------------------
# Deterministic parameter init (synthetic; not loaded from a checkpoint)
# ----------------------------------------------------------------------------
def _init_linear(key, din, dout):
    kw, kb = jax.random.split(key)
    s = 1.0 / math.sqrt(din)
    w = jax.random.uniform(kw, (din, dout), jnp.float32, -s, s)
    b = jax.random.uniform(kb, (dout,), jnp.float32, -s, s)
    return w, b


def init_params(key, D, R, H, num_qk_layer, num_v_layer, layer_index):
    hd = D // H
    keys = iter(jax.random.split(key, 64))
    p = {}
    p['fc_qk_x_w1'], p['fc_qk_x_b1'] = _init_linear(next(keys), D + 1, D)
    p['fc_qk_x_w2'], p['fc_qk_x_b2'] = _init_linear(next(keys), D, D)
    p['fc_v_x_w1'], p['fc_v_x_b1'] = _init_linear(next(keys), 2 * D, D)
    p['fc_v_x_w2'], p['fc_v_x_b2'] = _init_linear(next(keys), D, D)
    p['fc_to_qk_w'], p['fc_to_qk_b'] = _init_linear(next(keys), D, 4 * D)
    p['fc_qk_z_w'], p['fc_qk_z_b'] = _init_linear(next(keys), D, R * D)
    p['ffn_w1'], p['ffn_b1'] = _init_linear(next(keys), D, D)
    p['ffn_w2'], p['ffn_b2'] = _init_linear(next(keys), D, D)
    p['attn_norm_g'] = jnp.ones((D,), jnp.float32)
    p['attn_norm_b'] = jnp.zeros((D,), jnp.float32)
    p['norm_g'] = jnp.ones((D,), jnp.float32)
    p['norm_b'] = jnp.zeros((D,), jnp.float32)
    p['lambda_q1'] = 0.1 * jax.random.normal(next(keys), (hd,), jnp.float32)
    p['lambda_k1'] = 0.1 * jax.random.normal(next(keys), (hd,), jnp.float32)
    p['lambda_q2'] = 0.1 * jax.random.normal(next(keys), (hd,), jnp.float32)
    p['lambda_k2'] = 0.1 * jax.random.normal(next(keys), (hd,), jnp.float32)
    p['lambda_init'] = 0.8 - 0.6 * math.exp(-0.3 * layer_index)

    qk_layers = []
    for _ in range(num_qk_layer):
        lp = {}
        lp['w1'], lp['b1'] = _init_linear(next(keys), D, D)
        lp['w2'], lp['b2'] = _init_linear(next(keys), D, D)
        lp['mix'] = jax.random.normal(next(keys), (1, D), jnp.float32)   # alpha
        lp['ln_g'] = jnp.ones((D,), jnp.float32)
        lp['ln_b'] = jnp.zeros((D,), jnp.float32)
        qk_layers.append(lp)
    p['qk_layers'] = qk_layers

    v_layers = []
    for _ in range(num_v_layer):
        lp = {}
        lp['fc_z_w'], lp['fc_z_b'] = _init_linear(next(keys), D, R * D)
        lp['w1'], lp['b1'] = _init_linear(next(keys), D, D)
        lp['w2'], lp['b2'] = _init_linear(next(keys), D, D)
        lp['mix'] = jax.random.normal(next(keys), (1, D), jnp.float32)   # beta
        lp['ln_g'] = jnp.ones((D,), jnp.float32)
        lp['ln_b'] = jnp.zeros((D,), jnp.float32)
        v_layers.append(lp)
    p['v_layers'] = v_layers
    return p


# ----------------------------------------------------------------------------
if __name__ == "__main__":
    B, V, D, H, R, E = 2, 16, 32, 4, 4, 48
    num_qk_layer, num_v_layer, layer_index = 2, 2, 0

    key = jax.random.PRNGKey(0)
    k_param, k_x, k_z, k_noise, k_edge, k_h = jax.random.split(key, 6)
    params = init_params(k_param, D, R, H, num_qk_layer, num_v_layer, layer_index)

    x = jax.random.normal(k_x, (B, V, D), jnp.float32)
    z = jax.random.normal(k_z, (B, D), jnp.float32)
    # matches torch.zeros(B, V, 1).normal_(0, 4) (random per forward; fixed key here)
    qk_noise = 4.0 * jax.random.normal(k_noise, (B, V, 1), jnp.float32)
    h_index = jax.random.randint(k_h, (B,), 0, V)

    # synthetic graph: E triples (head, relation, tail); graph_mask = None.
    # Densified relational adjacency, pre-flattened to (R*V, V) and cast to bf16
    # (counts are small integers, exactly representable).
    ek1, ek2, ek3 = jax.random.split(k_edge, 3)
    heads = np.asarray(jax.random.randint(ek1, (E,), 0, V))
    rels = np.asarray(jax.random.randint(ek2, (E,), 0, R))
    tails = np.asarray(jax.random.randint(ek3, (E,), 0, V))
    A_np = np.zeros((R, V, V), np.float32)
    np.add.at(A_np, (rels, heads, tails), 1.0)
    A2d = jnp.asarray(A_np.reshape(R * V, V), dtype=jnp.bfloat16)

    out = knowformer_forward(PALLAS_OPS, params, H, h_index, x, z, A2d, qk_noise)
    out = jax.block_until_ready(out)
    ref = knowformer_forward(REF_OPS, params, H, h_index, x, z, A2d, qk_noise)
    ref = jax.block_until_ready(ref)

    assert out.shape == (B, V, D)
    assert np.isfinite(np.asarray(out)).all()
    err = float(jnp.max(jnp.abs(out - ref)))
    assert err < 1e-2, f"max abs error vs reference: {err}"
    print("KERNEL_OK")
</pallas_src>

<mosaic_0001>
module attributes {stable_mosaic.version = 11 : i64} {
  func.func @_linear_kernel(%arg0: i32, %arg1: memref<2x32xf32, #tpu.memory_space<vmem>>, %arg2: memref<32x128xf32, #tpu.memory_space<vmem>>, %arg3: memref<1x128xf32, #tpu.memory_space<vmem>>, %arg4: memref<2x128xf32, #tpu.memory_space<vmem>>) attributes {dimension_semantics = [#tpu.dimension_semantics<parallel>], iteration_bounds = array<i64: 1>, scalar_prefetch = 0 : i64, scratch_operands = 0 : i64, tpu.core_type = #tpu.core_type<tc>, window_params = [{transform_indices = @transform_0, window_bounds = array<i64: 2, 32>}, {pipeline_mode = #tpu.pipeline_mode<synchronous>, transform_indices = @transform_1, window_bounds = array<i64: 32, 128>}, {pipeline_mode = #tpu.pipeline_mode<synchronous>, transform_indices = @transform_2, window_bounds = array<i64: 1, 128>}, {transform_indices = @transform_3, window_bounds = array<i64: 2, 128>}]} {
    %c0 = arith.constant 0 : index
    %c0_0 = arith.constant 0 : index
    %0 = vector.load %arg1[%c0, %c0_0] : memref<2x32xf32, #tpu.memory_space<vmem>>, vector<2x32xf32>
    %c0_1 = arith.constant 0 : index
    %c0_2 = arith.constant 0 : index
    %1 = vector.load %arg2[%c0_1, %c0_2] : memref<32x128xf32, #tpu.memory_space<vmem>>, vector<32x128xf32>
    %2 = arith.truncf %0 : vector<2x32xf32> to vector<2x32xbf16>
    %3 = arith.truncf %1 : vector<32x128xf32> to vector<32x128xbf16>
    %cst = arith.constant dense<0.000000e+00> : vector<2x128xf32>
    %4 = tpu.matmul %2, %3, %cst {dimension_numbers = #tpu.dot_dimension_numbers<[1], [0], [0], [1], [0, 0, 1, 1], [], []>} : vector<2x32xbf16>, vector<32x128xbf16>, vector<2x128xf32> -> vector<2x128xf32>
    %c0_3 = arith.constant 0 : index
    %c0_4 = arith.constant 0 : index
    %5 = vector.load %arg3[%c0_3, %c0_4] : memref<1x128xf32, #tpu.memory_space<vmem>>, vector<1x128xf32>
    %6 = vector.broadcast %5 : vector<1x128xf32> to vector<2x128xf32>
    %7 = arith.addf %4, %6 : vector<2x128xf32>
    %c0_5 = arith.constant 0 : index
    %c0_6 = arith.constant 0 : index
    %8 = vector.load %arg4[%c0_5, %c0_6] : memref<2x128xf32, #tpu.memory_space<vmem>>, vector<2x128xf32>
    tpu.vector_store %arg4[%c0_5, %c0_6], %7 {strides = array<i32>} : memref<2x128xf32, #tpu.memory_space<vmem>>, vector<2x128xf32>,
    return
  }
  func.func @transform_0(%arg0: i32) -> (i32, i32) {
    %c0_i32 = arith.constant 0 : i32
    %c0_i32_0 = arith.constant 0 : i32
    return %arg0, %c0_i32 : i32, i32
  }
  func.func @transform_1(%arg0: i32) -> (i32, i32) {
    %c0_i32 = arith.constant 0 : i32
    %c0_i32_0 = arith.constant 0 : i32
    %c0_i32_1 = arith.constant 0 : i32
    return %c0_i32, %c0_i32_0 : i32, i32
  }
  func.func @transform_2(%arg0: i32) -> (i32, i32) {
    %c0_i32 = arith.constant 0 : i32
    %c0_i32_0 = arith.constant 0 : i32
    %c0_i32_1 = arith.constant 0 : i32
    return %c0_i32, %c0_i32_0 : i32, i32
  }
  func.func @transform_3(%arg0: i32) -> (i32, i32) {
    %c0_i32 = arith.constant 0 : i32
    %c0_i32_0 = arith.constant 0 : i32
    return %arg0, %c0_i32 : i32, i32
  }
}

</mosaic_0001>

<bundles_post_ra>
// kernel: tpu_custom_call.1
= control target key start
LH: loop header
LB: loop body
LE: loop exit
PB: predicated region body
PF: predicated region fallthrough
CT: control target
= control target key end

     0   :  { %8 = vsyncpa [#allocation3], 0  ;;  %s216_s0 = inlined_call_operand.hbm [shape: f32[2,32], index: 0, kind: input, shape index: {}]   ;;  %s217_s1 = inlined_call_operand.hbm [shape: f32[32,128], index: 1, kind: input, shape index: {}]   ;;  %s218_s2 = inlined_call_operand.vmem [shape: f32[1,128], index: 2, kind: input, shape index: {}]   ;;  %s219_s3 = inlined_call_operand.hbm [shape: f32[2,128], index: 3, kind: output, shape index: {}]  }
   0x1   :  { %9 = vsyncpa [#allocation6], 0 }
   0x2   :  { %10 = vsyncpa [#allocation4], 0  ;;  %s16_s14 = sshll.u32 %s216_s0, 4  ;;  %s179_s15 = smov [#allocation2]   ;;  %s17_s14 = int_to_ptr.hbm [resolvable:$true] %s16_s14 }
   0x3   :  { %s18_s16 = sshll.u32 %s179_s15, 4  ;;  %s26_s19 = sshll.u32 %s217_s1, 4  ;;  %s19_s16 = int_to_ptr.vmem [resolvable:$true] %s18_s16  ;;  %s27_s19 = int_to_ptr.hbm [resolvable:$true] %s26_s19 }
   0x4   :  { %21 = dma.hbm_to_vmem [thread:$0]  %s17_s14, 32, %s19_s16, [#allocation3]  }
   0x5   :  { %s180_s20 = smov [#allocation5]   ;;  %s181_s22 = smov 128  }
   0x6   :  { %s28_s21 = sshll.u32 %s180_s20, 4  ;;  %s182_s23 = smov 8   ;;  %s29_s21 = int_to_ptr.vmem [resolvable:$true] %s28_s21 }
   0x7   :  { %34 = dma.hbm_to_vmem [thread:$0]  %s27_s19, 512, %s29_s21, [#allocation6], %s181_s22, %s181_s22, %s182_s23  }
   0x8   :  { %173 = dma.done.wait [#allocation3], 32  }
   0x9   :  { %174 = vsyncadd [#allocation3], 4294967264 }
   0xa   :  { %175 = dma.done.wait [#allocation6], 512  }
   0xb   :  { %176 = vsyncadd [#allocation6], 4294966784  ;;  %v49_v0 = vld [vmem:[#allocation5 + $0x10] sm:$0xff]  ;;  %v50_v1 = vld [vmem:[#allocation5 + $0x18] sm:$0xff]  ;;  %vm58_vm0 = vcmask 261120   ;;  %s183_s24 = smov [#allocation7]  }
   0xc   :  { %v47_v2 = vld [vmem:[#allocation5] sm:$0xff]  ;;  %v53_v3 = vpack.c.bf16 %v50_v1, %v49_v0  ;;  %v48_v4 = vld [vmem:[#allocation5 + $0x8] sm:$0xff]  ;;  %v46_v6 = vld [vmem:[#allocation2] sm:$0x3]  ;;  %s81_s25 = sshll.u32 %s183_s24, 4  ;;  %s83_s28 = sshll.u32 %s219_s3, 4  ;;  %s82_s25 = int_to_ptr.vmem [resolvable:$true] %s81_s25  ;;  %s84_s28 = int_to_ptr.hbm [resolvable:$true] %s83_s28 }
   0xd   :  { %v52_v5 = vpack.c.bf16 %v48_v4, %v47_v2  ;;  %v51_v7 = vpack.c.bf16 %v46_v6, %v46_v6  ;;  %v100_v8 = vld [vmem:[%s218_s2] ss:$0 sm:$0xff] }
   0xe   :  { %68 = vmatpush.bf16.msra.mxu0 %v53_v3 }
  0x12   :  { %69 = vmatpush.bf16.msra.mxu0 %v52_v5 }
  0x15   :  { %94 = vmatmul.msk.bf16.vlgmr.msra.gmra.mxu0 %vm58_vm0, %v51_v7 }
  0x92   :  { %v71_v9 = vpop.f32.mrf.mxu0 }
  0x93   :  { %v72_v10 = vadd.f32 %v100_v8, %v71_v9 }
  0x95   :  { %75 = vst [vmem:[#allocation7] sm:$0x3] %v72_v10 }
  0x96   :  { %86 = dma.vmem_to_hbm [thread:$0]  %s82_s25, 32, %s84_s28, [#allocation4]  }
  0x9a   :  { %v73_v11 = vpop.f32.mrf.mxu0 }
  0x9b   :  { %177 = dma.done.wait [#allocation4], 32  }
  0x9c   :  { %178 = vsyncadd [#allocation4], 4294967264 }
  0x9d   :  { %91 = vsyncpa [#allocation3], 1 }
  0x9e   :  { %92 = vsyncpa [#allocation6], 1 }
  0x9f   :  { %93 = vsyncpa [#allocation4], 1 }

</bundles_post_ra>
